<compile_context>
chip_gen: v7x
topology: tpu7x:2x2x1
jax: 0.10.0
libtpu: 0.0.40
codegen_flags: <defaults>
</compile_context>

<pallas_src>
import jax
import jax.numpy as jnp
from jax.experimental import pallas as pl
from jax.experimental.pallas import tpu as pltpu


def _linear_kernel(x_ref, w_ref, b_ref, o_ref):
    # x_ref: (tb, K) f32   w_ref: (K, N) bf16   b_ref: (1, N) f32   o_ref: (tb, N)
    x = x_ref[...].astype(w_ref.dtype)           # in-kernel f32->bf16 (VPU, hidden under DMA)
    acc = jnp.dot(x, w_ref[...], preferred_element_type=jnp.float32)
    o_ref[...] = (acc + b_ref[...].astype(jnp.float32)).astype(o_ref.dtype)


def extractor_mlp_feat(x, w_t, b, *, tb=None, out_dtype=None):
    """feat = x @ w_t + b  (nn.Linear with weight stored pre-transposed as (K, N)).

    Covers the 'v' and 't20' branches of ExtractorMLP.forward (both a single Linear).

    Expectations (per perf review):
      * `w_t` should already be stored in the compute dtype (bf16) -- it is passed
        straight through, no per-call cast.
      * `x` is passed in its native dtype (f32); it is cast to w_t.dtype inside
        the kernel, so it is read from HBM exactly once.
      * Weight stays fully resident in VMEM (K*N*2 B ~ 0.2 MiB at the shipped
        size); for much larger K add a K grid axis + f32 accumulator instead of
        growing the block.
    """
    B, K = x.shape
    Kw, N = w_t.shape
    assert K == Kw, f"feature mismatch: x has {K}, weight has {Kw}"
    out_dtype = x.dtype if out_dtype is None else jnp.dtype(out_dtype)

    # ---- tile size ----
    # Single call at realistic batch -> one tile (block dim == full dim is always a
    # legal layout).  For large B, stream 1024-row (8-aligned) tiles; the ragged
    # final block is handled by Pallas masked stores.
    cap = 1024
    if tb is None:
        tb = B if B <= cap else cap
    tb = max(1, min(tb, max(B, 8)))
    grid_n = pl.cdiv(B, tb)

    # ---- bias as a (1, N) f32 row (few hundred bytes; reshape is free) ----
    b2d = b.astype(jnp.float32).reshape(1, N)

    # Megacore (v7x dual-TC): shard the batch grid whenever there is >1 tile.
    # On v5e/v6e (single TC) this choice is a measured no-op.
    sem = "parallel" if grid_n > 1 else "arbitrary"

    # ---- explicit VMEM budget (double-buffered) so v7x (64 MiB) fails loudly ----
    x_bytes = tb * K * x.dtype.itemsize
    w_bytes = K * N * w_t.dtype.itemsize
    b_bytes = N * 4
    o_bytes = tb * N * out_dtype.itemsize
    vmem_needed = 2 * (x_bytes + w_bytes + b_bytes + o_bytes)
    vmem_limit = int(min(max(vmem_needed + (4 << 20), 8 << 20), 100 << 20))

    cost = pl.CostEstimate(
        flops=2 * B * K * N,
        transcendentals=0,
        bytes_accessed=(B * K * x.dtype.itemsize + K * N * w_t.dtype.itemsize
                        + N * 4 + B * N * out_dtype.itemsize),
    )

    return pl.pallas_call(
        _linear_kernel,
        out_shape=jax.ShapeDtypeStruct((B, N), out_dtype),
        grid_spec=pltpu.PrefetchScalarGridSpec(
            num_scalar_prefetch=0,
            grid=(grid_n,),
            in_specs=[
                pl.BlockSpec((tb, K), lambda i: (i, 0)),   # batch-tiled input (f32)
                pl.BlockSpec((K, N), lambda i: (0, 0)),    # full weight resident (bf16)
                pl.BlockSpec((1, N), lambda i: (0, 0)),    # bias (f32)
            ],
            out_specs=pl.BlockSpec((tb, N), lambda i: (i, 0)),
        ),
        compiler_params=pltpu.CompilerParams(
            dimension_semantics=(sem,),
            vmem_limit_bytes=vmem_limit,
        ),
        cost_estimate=cost,
    )(x, w_t, b2d)


def init_linear_params(key, in_features, out_features,
                       weight_dtype=jnp.bfloat16, bias_dtype=jnp.float32):
    """Init mimicking PyTorch nn.Linear default (U(-1/sqrt(fan_in), +)).

    The weight is returned pre-transposed (K, N) and PRE-CAST to `weight_dtype`
    (bf16) so the kernel never re-casts it per call.
    """
    kw, kb = jax.random.split(key)
    bound = 1.0 / float(np_sqrt(in_features))
    w_t = jax.random.uniform(kw, (in_features, out_features), jnp.float32,
                             -bound, bound).astype(weight_dtype)
    b = jax.random.uniform(kb, (out_features,), jnp.float32,
                           -bound, bound).astype(bias_dtype)
    return w_t, b


def np_sqrt(x):
    import math
    return math.sqrt(x)


# TODO(synk): the 'vt20t' branch of the original module indexes x[:, 196] (a single
# row) yet feeds it to a Linear expecting out_dim*196 features -- shape-inconsistent
# in the PyTorch source, so only the 'v' / 't20' paths (a single Linear) are
# implemented here.

if __name__ == "__main__":
    key = jax.random.PRNGKey(0)
    k_x, k_pv, k_pt = jax.random.split(key, 3)

    B = 16
    out_dim = 4
    hidden = 128

    # ---------------- input_type='v': in_features = out_dim * 196 ----------------
    in_feat_v = out_dim * 196  # 784
    x = jax.random.normal(k_x, (B, in_feat_v), jnp.float32)
    w_t, b = init_linear_params(k_pv, in_feat_v, hidden)   # weight already bf16

    feat = jax.block_until_ready(extractor_mlp_feat(x, w_t, b))
    assert feat.shape == (B, hidden)

    # Reference vs full-f32 Linear (loose: intentional bf16 precision trade).
    ref = x @ w_t.astype(jnp.float32) + b
    assert jnp.allclose(feat, ref, atol=5e-2, rtol=5e-2), (
        float(jnp.max(jnp.abs(feat - ref))))

    # Tighter check against a reference with matched bf16 cast + f32 accumulation.
    ref_bf16 = (x.astype(jnp.bfloat16).astype(jnp.float32)
                @ w_t.astype(jnp.float32) + b)
    assert jnp.allclose(feat, ref_bf16, atol=2e-3, rtol=2e-3)

    # Non-divisible batch exercises the single-tile full-dim path (no pad/slice ops).
    x_odd = jax.random.normal(k_x, (B + 3, in_feat_v), jnp.float32)
    feat_odd = jax.block_until_ready(extractor_mlp_feat(x_odd, w_t, b))
    assert feat_odd.shape == (B + 3, hidden)
    assert jnp.allclose(feat_odd, x_odd @ w_t.astype(jnp.float32) + b,
                        atol=5e-2, rtol=5e-2)

    # Force a multi-tile ragged grid (tb=8, B=19) to validate masked final-block stores.
    feat_rag = jax.block_until_ready(extractor_mlp_feat(x_odd, w_t, b, tb=8))
    assert feat_rag.shape == (B + 3, hidden)
    assert jnp.allclose(feat_rag, x_odd @ w_t.astype(jnp.float32) + b,
                        atol=5e-2, rtol=5e-2)

    # bf16 output path (halves writeback) stays numerically consistent.
    feat_bf16 = jax.block_until_ready(
        extractor_mlp_feat(x, w_t, b, out_dtype=jnp.bfloat16))
    assert feat_bf16.dtype == jnp.bfloat16
    assert jnp.allclose(feat_bf16.astype(jnp.float32), ref_bf16, atol=2e-2, rtol=2e-2)

    # ---------------- input_type='t20': in_features = out_dim * 20 ----------------
    in_feat_t = out_dim * 20  # 80
    x_t = jax.random.normal(k_x, (B, in_feat_t), jnp.float32)
    w_t2, b2 = init_linear_params(k_pt, in_feat_t, hidden)
    feat_t = jax.block_until_ready(extractor_mlp_feat(x_t, w_t2, b2))
    assert feat_t.shape == (B, hidden)
    assert jnp.allclose(feat_t, x_t @ w_t2.astype(jnp.float32) + b2,
                        atol=5e-2, rtol=5e-2)

    print("KERNEL_OK")
</pallas_src>

<mosaic_0001>
module attributes {stable_mosaic.version = 11 : i64} {
  func.func @_linear_kernel(%arg0: i32, %arg1: memref<16x784xf32, #tpu.memory_space<vmem>>, %arg2: memref<784x128xbf16, #tpu.memory_space<vmem>>, %arg3: memref<1x128xf32, #tpu.memory_space<vmem>>, %arg4: memref<16x128xf32, #tpu.memory_space<vmem>>) attributes {dimension_semantics = [#tpu.dimension_semantics<arbitrary>], iteration_bounds = array<i64: 1>, scalar_prefetch = 0 : i64, scratch_operands = 0 : i64, tpu.core_type = #tpu.core_type<tc>, window_params = [{transform_indices = @transform_0, window_bounds = array<i64: 16, 784>}, {pipeline_mode = #tpu.pipeline_mode<synchronous>, transform_indices = @transform_1, window_bounds = array<i64: 784, 128>}, {pipeline_mode = #tpu.pipeline_mode<synchronous>, transform_indices = @transform_2, window_bounds = array<i64: 1, 128>}, {transform_indices = @transform_3, window_bounds = array<i64: 16, 128>}]} {
    %c0 = arith.constant 0 : index
    %c0_0 = arith.constant 0 : index
    %0 = vector.load %arg1[%c0, %c0_0] : memref<16x784xf32, #tpu.memory_space<vmem>>, vector<16x784xf32>
    %1 = arith.truncf %0 : vector<16x784xf32> to vector<16x784xbf16>
    %c0_1 = arith.constant 0 : index
    %c0_2 = arith.constant 0 : index
    %2 = vector.load %arg2[%c0_1, %c0_2] : memref<784x128xbf16, #tpu.memory_space<vmem>>, vector<784x128xbf16>
    %cst = arith.constant dense<0.000000e+00> : vector<16x128xf32>
    %3 = tpu.matmul %1, %2, %cst {dimension_numbers = #tpu.dot_dimension_numbers<[1], [0], [0], [1], [0, 0, 1, 1], [], []>} : vector<16x784xbf16>, vector<784x128xbf16>, vector<16x128xf32> -> vector<16x128xf32>
    %c0_3 = arith.constant 0 : index
    %c0_4 = arith.constant 0 : index
    %4 = vector.load %arg3[%c0_3, %c0_4] : memref<1x128xf32, #tpu.memory_space<vmem>>, vector<1x128xf32>
    %5 = vector.broadcast %4 : vector<1x128xf32> to vector<16x128xf32>
    %6 = arith.addf %3, %5 : vector<16x128xf32>
    %c0_5 = arith.constant 0 : index
    %c0_6 = arith.constant 0 : index
    %7 = vector.load %arg4[%c0_5, %c0_6] : memref<16x128xf32, #tpu.memory_space<vmem>>, vector<16x128xf32>
    tpu.vector_store %arg4[%c0_5, %c0_6], %6 {strides = array<i32>} : memref<16x128xf32, #tpu.memory_space<vmem>>, vector<16x128xf32>,
    return
  }
  func.func @transform_0(%arg0: i32) -> (i32, i32) {
    %c0_i32 = arith.constant 0 : i32
    %c0_i32_0 = arith.constant 0 : i32
    return %arg0, %c0_i32 : i32, i32
  }
  func.func @transform_1(%arg0: i32) -> (i32, i32) {
    %c0_i32 = arith.constant 0 : i32
    %c0_i32_0 = arith.constant 0 : i32
    %c0_i32_1 = arith.constant 0 : i32
    return %c0_i32, %c0_i32_0 : i32, i32
  }
  func.func @transform_2(%arg0: i32) -> (i32, i32) {
    %c0_i32 = arith.constant 0 : i32
    %c0_i32_0 = arith.constant 0 : i32
    %c0_i32_1 = arith.constant 0 : i32
    return %c0_i32, %c0_i32_0 : i32, i32
  }
  func.func @transform_3(%arg0: i32) -> (i32, i32) {
    %c0_i32 = arith.constant 0 : i32
    %c0_i32_0 = arith.constant 0 : i32
    return %arg0, %c0_i32 : i32, i32
  }
}

</mosaic_0001>

<bundles_post_ra>
// kernel: tpu_custom_call.1
= control target key start
LH: loop header
LB: loop body
LE: loop exit
PB: predicated region body
PF: predicated region fallthrough
CT: control target
= control target key end

     0   :  { %8 = vsyncpa [#allocation3], 0  ;;  %s979_s0 = inlined_call_operand.hbm [shape: f32[16,784], index: 0, kind: input, shape index: {}]   ;;  %s980_s1 = inlined_call_operand.hbm [shape: bf16[784,128], index: 1, kind: input, shape index: {}]   ;;  %s981_s2 = inlined_call_operand.vmem [shape: f32[1,128], index: 2, kind: input, shape index: {}]   ;;  %s982_s3 = inlined_call_operand.hbm [shape: f32[16,128], index: 3, kind: output, shape index: {}]  }
   0x1   :  { %9 = vsyncpa [#allocation6], 0 }
   0x2   :  { %10 = vsyncpa [#allocation4], 0  ;;  %s909_s12 = smov [#allocation2]   ;;  %s837_s16 = scalar_lea.hbm %s979_s0, 1792 }
   0x3   :  { %s16_s13 = sshll.u32 %s909_s12, 4  ;;  %p838_p0 = scmp.ne.s32.totalorder %s979_s0, %s837_s16  ;;  %s17_s13 = int_to_ptr.vmem [resolvable:$true] %s16_s13 }
   0x4   :  { %p841_p1 = scmp.lt.u32.totalorder %s837_s16, %s979_s0 }
   0x6   :  { %p843_p2 = pnand %p841_p1, %p838_p0 }
   0x8   :  { %846 = shalt.err (!%p843_p2)
}
   0x9   :  { %s847_s21 = scalar_lea.vmem %s17_s13, 1792  ;;  %p852_p4 = scmp.lt.s32.totalorder %s17_s13, %s17_s13 }
   0xa   :  { %p848_p3 = scmp.ne.s32.totalorder %s17_s13, %s847_s21  ;;  %p853_p5 = scmp.lt.s32.totalorder %s847_s21, %s847_s21 }
   0xc   :  { %p854_p6 = por %p853_p5, %p852_p4 }
   0xe   :  { %p855_p7 = pnand %p854_p6, %p848_p3 }
  0x10   :  { %858 = shalt.err (!%p855_p7)
}
  0x11   :  { %s910_s22 = smov 896   ;;  %s911_s23 = smov 56  }
  0x12   :  { %22 = dma.hbm_to_vmem [thread:$0]  %s979_s0, 1792, %s17_s13, [#allocation3], %s910_s22, %s910_s22, %s911_s23  }
  0x13   :  { %s912_s26 = smov [#allocation5]   ;;  %s859_s30 = scalar_lea.hbm %s980_s1, 6272 }
  0x14   :  { %s28_s27 = sshll.u32 %s912_s26, 4  ;;  %p860_p8 = scmp.ne.s32.totalorder %s980_s1, %s859_s30  ;;  %s29_s27 = int_to_ptr.vmem [resolvable:$true] %s28_s27 }
  0x15   :  { %p863_p9 = scmp.lt.u32.totalorder %s859_s30, %s980_s1 }
  0x17   :  { %p865_p10 = pnand %p863_p9, %p860_p8 }
  0x19   :  { %868 = shalt.err (!%p865_p10)
}
  0x1a   :  { %s869_s8 = scalar_lea.vmem %s29_s27, 6272  ;;  %p874_p12 = scmp.lt.s32.totalorder %s29_s27, %s29_s27 }
  0x1b   :  { %p870_p11 = scmp.ne.s32.totalorder %s29_s27, %s869_s8  ;;  %p875_p13 = scmp.lt.s32.totalorder %s869_s8, %s869_s8 }
  0x1d   :  { %p876_p0 = por %p875_p13, %p874_p12 }
  0x1f   :  { %p877_p1 = pnand %p876_p0, %p870_p11 }
  0x21   :  { %880 = shalt.err (!%p877_p1)
}
  0x22   :  { %s913_s0 = smov 64   ;;  %s914_s9 = smov 4  }
  0x23   :  { %34 = dma.hbm_to_vmem [thread:$0]  %s980_s1, 6272, %s29_s27, [#allocation6], %s913_s0, %s913_s0, %s914_s9  }
  0x24   :  { %903 = dma.done.wait [#allocation3], 1792  }
  0x25   :  { %904 = vsyncadd [#allocation3], 4294965504 }
  0x26   :  { %905 = dma.done.wait [#allocation6], 6272  }
  0x27   :  { %906 = vsyncadd [#allocation6], 4294961024  ;;  %v788_v0 = vld [vmem:[#allocation5 + $0x40] sm:$0xff]   ;;  %v792_v4 = vld [vmem:[#allocation5 + $0x48] sm:$0xff]   ;;  %v915_v43 = vmov 0.0   ;;  %vm916_vm0 = vmmov 0  }
  0x28   :  { %v789_v1 = vld [vmem:[#allocation5] sm:$0xff]   ;;  %703 = vmatprep.subr.bf16.mxu0 %v788_v0  ;;  %v793_v5 = vld [vmem:[#allocation5 + $0x8] sm:$0xff]   ;;  %v796_v8 = vld [vmem:[#allocation5 + $0x50] sm:$0xff]   ;;  %vm464_vm1 = vcmask 130048  }
  0x29   :  { %v790_v2 = vld [vmem:[#allocation5 + $0xc0] sm:$0xff]   ;;  %704 = vmatpush3.bf16.msra.mxu0 %v789_v1  ;;  %v794_v6 = vld [vmem:[#allocation5 + $0xc8] sm:$0xff]   ;;  %v797_v9 = vld [vmem:[#allocation5 + $0x10] sm:$0xff]  }
  0x2a   :  { %v791_v3 = vld [vmem:[#allocation5 + $0x80] sm:$0xff]   ;;  %725 = vmatprep.subr.bf16.mxu1 %v790_v2  ;;  %705 = vmatprep.subr.bf16.mxu0 %v792_v4  ;;  %v795_v7 = vld [vmem:[#allocation5 + $0x88] sm:$0xff]   ;;  %v798_v10 = vld [vmem:[#allocation5 + $0xd0] sm:$0xff]  }
  0x2b   :  { %726 = vmatpush3.bf16.msra.mxu1 %v791_v3  ;;  %v799_v11 = vld [vmem:[#allocation5 + $0x90] sm:$0xff]   ;;  %v800_v12 = vld [vmem:[#allocation5 + $0x58] sm:$0xff]   ;;  %v804_v16 = vld [vmem:[#allocation5 + $0x60] sm:$0xff]  }
  0x2c   :  { %727 = vmatprep.subr.bf16.mxu1 %v794_v6  ;;  %v801_v13 = vld [vmem:[#allocation5 + $0x18] sm:$0xff]   ;;  %v805_v17 = vld [vmem:[#allocation5 + $0x20] sm:$0xff]   ;;  %v808_v20 = vld [vmem:[#allocation5 + $0x68] sm:$0xff]  }
  0x2d   :  { %706 = vmatpush3.bf16.msra.mxu0 %v793_v5  ;;  %v802_v14 = vld [vmem:[#allocation5 + $0xd8] sm:$0xff]   ;;  %v806_v18 = vld [vmem:[#allocation5 + $0xe0] sm:$0xff]   ;;  %v809_v21 = vld [vmem:[#allocation5 + $0x28] sm:$0xff]  }
  0x2e   :  { %707 = vmatprep.subr.bf16.mxu0 %v796_v8  ;;  %v803_v15 = vld [vmem:[#allocation5 + $0x98] sm:$0xff]   ;;  %v807_v19 = vld [vmem:[#allocation5 + $0xa0] sm:$0xff]   ;;  %v810_v22 = vld [vmem:[#allocation5 + $0xe8] sm:$0xff]  }
  0x2f   :  { %728 = vmatpush3.bf16.msra.mxu1 %v795_v7  ;;  %v811_v23 = vld [vmem:[#allocation5 + $0xa8] sm:$0xff]   ;;  %v812_v24 = vld [vmem:[#allocation5 + $0x70] sm:$0xff]   ;;  %v816_v28 = vld [vmem:[#allocation5 + $0x78] sm:$0xff]  }
  0x30   :  { %729 = vmatprep.subr.bf16.mxu1 %v798_v10  ;;  %v813_v25 = vld [vmem:[#allocation5 + $0x30] sm:$0xff]   ;;  %v817_v29 = vld [vmem:[#allocation5 + $0x38] sm:$0xff]   ;;  %v51_v36 = vld [vmem:[#allocation2 + $0x38] sm:$0xff] }
  0x31   :  { %708 = vmatpush3.bf16.msra.mxu0 %v797_v9  ;;  %v814_v26 = vld [vmem:[#allocation5 + $0xf0] sm:$0xff]   ;;  %v818_v30 = vld [vmem:[#allocation5 + $0xf8] sm:$0xff]   ;;  %v820_v38 = vld [vmem:[#allocation5 + $0x140] sm:$0xff]  }
  0x32   :  { %709 = vmatprep.subr.bf16.mxu0 %v800_v12  ;;  %v815_v27 = vld [vmem:[#allocation5 + $0xb0] sm:$0xff]   ;;  %v45_v31 = vld [vmem:[#allocation2 + $0x8] sm:$0xff]  ;;  %v47_v39 = vld [vmem:[#allocation2 + $0x18] sm:$0xff] }
  0x33   :  { %730 = vmatpush3.bf16.msra.mxu1 %v799_v11  ;;  %v52_v32 = vld [vmem:[#allocation2 + $0x40] sm:$0xff]  ;;  %v819_v34 = vld [vmem:[#allocation5 + $0xb8] sm:$0xff]   ;;  %v54_v40 = vld [vmem:[#allocation2 + $0x50] sm:$0xff] }
  0x34   :  { %731 = vmatprep.subr.bf16.mxu1 %v802_v14  ;;  %v59_v33 = vpack.c.bf16 %v52_v32, %v45_v31  ;;  %v44_v35 = vld [vmem:[#allocation2] sm:$0xff]  ;;  %v61_v41 = vpack.c.bf16 %v54_v40, %v47_v39  ;;  %v821_v42 = vld [vmem:[#allocation5 + $0x100] sm:$0xff]   ;;  %v53_v45 = vld [vmem:[#allocation2 + $0x48] sm:$0xff] }
  0x35   :  { %710 = vmatpush3.bf16.msra.mxu0 %v801_v13  ;;  %v58_v37 = vpack.c.bf16 %v51_v36, %v44_v35  ;;  %v46_v44 = vld [vmem:[#allocation2 + $0x10] sm:$0xff]  ;;  %v822_v47 = vld [vmem:[#allocation5 + $0x148] sm:$0xff]   ;;  %v824_v49 = vld [vmem:[#allocation5 + $0x150] sm:$0xff]  }
  0x36   :  { %711 = vmatprep.subr.bf16.mxu0 %v804_v16  ;;  %500 = vmatprep.mubr.bf16.mxu0 %v59_v33  ;;  %v60_v46 = vpack.c.bf16 %v53_v45, %v46_v44  ;;  %v823_v48 = vld [vmem:[#allocation5 + $0x108] sm:$0xff]   ;;  %v825_v50 = vld [vmem:[#allocation5 + $0x110] sm:$0xff]   ;;  %v826_v51 = vld [vmem:[#allocation5 + $0x158] sm:$0xff]  }
  0x37   :  { %732 = vmatpush3.bf16.msra.mxu1 %v803_v15  ;;  %541 = vmatprep.mubr.bf16.mxu1 %v61_v41  ;;  %v827_v52 = vld [vmem:[#allocation5 + $0x118] sm:$0xff]   ;;  %v828_v53 = vld [vmem:[#allocation5 + $0x160] sm:$0xff]   ;;  %v830_v55 = vld [vmem:[#allocation5 + $0x168] sm:$0xff]  }
  0x38   :  { %733 = vmatprep.subr.bf16.mxu1 %v806_v18  ;;  %v829_v54 = vld [vmem:[#allocation5 + $0x120] sm:$0xff]   ;;  %v49_v57 = vld [vmem:[#allocation2 + $0x28] sm:$0xff]  ;;  %v56_v58 = vld [vmem:[#allocation2 + $0x60] sm:$0xff] }
  0x39   :  { %712 = vmatpush3.bf16.msra.mxu0 %v805_v17  ;;  %v836_v56 = vld [vmem:[#allocation5 + $0x180] sm:$0xff]   ;;  %v831_v59 = vld [vmem:[#allocation5 + $0x128] sm:$0xff]   ;;  %v63_v60 = vpack.c.bf16 %v56_v58, %v49_v57  ;;  %v57_v62 = vld [vmem:[#allocation2 + $0x68] sm:$0xff] }
  0x3a   :  { %713 = vmatprep.subr.bf16.mxu0 %v808_v20  ;;  %v50_v61 = vld [vmem:[#allocation2 + $0x30] sm:$0xff]  ;;  %v832_v63 = vld [vmem:[#allocation5 + $0x170] sm:$0xff]   ;;  %v834_v2 = vld [vmem:[#allocation5 + $0x178] sm:$0xff]  }
  0x3b   :  { %734 = vmatpush3.bf16.msra.mxu1 %v807_v19  ;;  %v64_v0 = vpack.c.bf16 %v57_v62, %v50_v61  ;;  %v833_v1 = vld [vmem:[#allocation5 + $0x130] sm:$0xff]   ;;  %v835_v3 = vld [vmem:[#allocation5 + $0x138] sm:$0xff]   ;;  %v55_v5 = vld [vmem:[#allocation2 + $0x58] sm:$0xff] }
  0x3c   :  { %735 = vmatprep.subr.bf16.mxu1 %v810_v22  ;;  %v48_v4 = vld [vmem:[#allocation2 + $0x20] sm:$0xff] }
  0x3d   :  { %714 = vmatpush3.bf16.msra.mxu0 %v809_v21  ;;  %v62_v6 = vpack.c.bf16 %v55_v5, %v48_v4  ;;  %v652_v8 = vld [vmem:[%s981_s2] ss:$0 sm:$0xff]  ;;  %s917_s2 = smov [#allocation7]  }
  0x3e   :  { %715 = vmatprep.subr.bf16.mxu0 %v812_v24  ;;  %s639_s13 = sshll.u32 %s917_s2, 4  ;;  %s640_s13 = int_to_ptr.vmem [resolvable:$true] %s639_s13 }
  0x3f   :  { %736 = vmatpush3.bf16.msra.mxu1 %v811_v23  ;;  %s881_s14 = scalar_lea.vmem %s640_s13, 256  ;;  %p886_p3 = scmp.lt.s32.totalorder %s640_s13, %s640_s13 }
  0x40   :  { %737 = vmatprep.subr.bf16.mxu1 %v814_v26  ;;  %p882_p2 = scmp.ne.s32.totalorder %s640_s13, %s881_s14  ;;  %p887_p4 = scmp.lt.s32.totalorder %s881_s14, %s881_s14 }
  0x41   :  { %716 = vmatpush3.bf16.msra.mxu0 %v813_v25 }
  0x42   :  { %717 = vmatprep.subr.bf16.mxu0 %v816_v28  ;;  %p888_p5 = por %p887_p4, %p886_p3 }
  0x43   :  { %738 = vmatpush3.bf16.msra.mxu1 %v815_v27 }
  0x44   :  { %739 = vmatprep.subr.bf16.mxu1 %v818_v30  ;;  %p889_p6 = pnand %p888_p5, %p882_p2 }
  0x45   :  { %718 = vmatpush3.bf16.msra.mxu0 %v817_v29 }
  0x46   :  { %747 = vmatprep.subr.bf16.mxu0 %v820_v38 }
  0x47   :  { %740 = vmatpush3.bf16.msra.mxu1 %v819_v34 }
  0x48   :  { %771 = vmatprep.subr.bf16.mxu1 %v915_v43  ;;  %501 = vmatmul.mubr.bf16.vlgmr.msra.gmra.mrb[0].mxu0 %v58_v37 }
  0x49   :  { %748 = vmatpush3.bf16.msra.mxu0 %v821_v42  ;;  %582 = vmatprep.mubr.bf16.mxu0 %v63_v60 }
  0x4a   :  { %542 = vmatmul.mubr.bf16.vlgmr.msra.gmra.mrb[0].mxu1 %v60_v46  ;;  %749 = vmatprep.subr.bf16.mxu0 %v822_v47 }
  0x4b   :  { %773 = vmatprep.mubr.msk.bf16.mxu1 %vm916_vm0, %v915_v43  ;;  %772 = vmatpush3.bf16.msra.mxu1 %v836_v56 }
  0x4d   :  { %750 = vmatpush3.bf16.msra.mxu0 %v823_v48 }
  0x4e   :  { %751 = vmatprep.subr.bf16.mxu0 %v824_v49 }
  0x51   :  { %752 = vmatpush3.bf16.msra.mxu0 %v825_v50 }
  0x52   :  { %753 = vmatprep.subr.bf16.mxu0 %v826_v51  ;;  %774 = vmatmul.mubr.msk.bf16.vlgmr.msra.gmra.mrb[4].mxu1 %vm464_vm1, %v64_v0 }
  0x55   :  { %754 = vmatpush3.bf16.msra.mxu0 %v827_v52 }
  0x56   :  { %755 = vmatprep.subr.bf16.mxu0 %v828_v53 }
  0x59   :  { %756 = vmatpush3.bf16.msra.mxu0 %v829_v54 }
  0x5a   :  { %757 = vmatprep.subr.bf16.mxu0 %v830_v55 }
  0x5d   :  { %758 = vmatpush3.bf16.msra.mxu0 %v831_v59 }
  0x5e   :  { %759 = vmatprep.subr.bf16.mxu0 %v832_v63 }
  0x61   :  { %760 = vmatpush3.bf16.msra.mxu0 %v833_v1 }
  0x62   :  { %761 = vmatprep.subr.bf16.mxu0 %v834_v2 }
  0x65   :  { %762 = vmatpush3.bf16.msra.mxu0 %v835_v3 }
  0x68   :  { %583 = vmatmul.mubr.bf16.vlgmr.msra.gmra.mrb[4].mxu0 %v62_v6 }
 0x11b   :  { %v719_v7 = vpop.f32.mrb[0].mxu0 }
 0x11c   :  { %v720_v9 = vpop.f32.mrb[1].mxu0 }
 0x11d   :  { %v721_v10 = vadd.f32 %v720_v9, %v719_v7  ;;  %v722_v11 = vpop.f32.mrb[2].mxu0  ;;  %v741_v12 = vpop.f32.mrb[0].mxu1 }
 0x11e   :  { %v723_v13 = vpop.f32.mrb[3].mxu0  ;;  %v742_v16 = vpop.f32.mrb[1].mxu1 }
 0x11f   :  { %v503_v14 = vadd.f32 %v721_v10, %v652_v8  ;;  %v724_v15 = vadd.f32 %v723_v13, %v722_v11  ;;  %v743_v17 = vadd.f32 %v742_v16, %v741_v12  ;;  %v744_v18 = vpop.f32.mrb[2].mxu1 }
 0x120   :  { %v745_v20 = vpop.f32.mrb[3].mxu1 }
 0x121   :  { %v506_v19 = vadd.f32 %v724_v15, %v652_v8  ;;  %v544_v21 = vadd.f32 %v743_v17, %v503_v14  ;;  %v746_v22 = vadd.f32 %v745_v20, %v744_v18 }
 0x123   :  { %v547_v23 = vadd.f32 %v746_v22, %v506_v19 }
 0x125   :  { %v625_v24 = vpop.f32.mrb[4].mxu1 }
 0x126   :  { %v775_v25 = vpop.f32.mrb[5].mxu1 }
 0x127   :  { %v628_v26 = vpop.f32.mrb[6].mxu1 }
 0x128   :  { %v776_v27 = vpop.f32.mrb[7].mxu1 }
 0x13b   :  { %v763_v28 = vpop.f32.mrb[4].mxu0 }
 0x13c   :  { %v764_v29 = vpop.f32.mrb[5].mxu0 }
 0x13d   :  { %v765_v30 = vadd.f32 %v764_v29, %v763_v28  ;;  %v766_v31 = vpop.f32.mrb[6].mxu0 }
 0x13e   :  { %v767_v32 = vpop.f32.mrb[7].mxu0 }
 0x13f   :  { %v585_v33 = vadd.f32 %v765_v30, %v544_v21  ;;  %v768_v34 = vadd.f32 %v767_v32, %v766_v31 }
 0x141   :  { %v626_v35 = vadd.f32 %v625_v24, %v585_v33  ;;  %v588_v36 = vadd.f32 %v768_v34, %v547_v23 }
 0x143   :  { %632 = vst [vmem:[#allocation7] sm:$0xff] %v626_v35  ;;  %v629_v37 = vadd.f32 %v628_v26, %v588_v36 }
 0x145   :  { %633 = vst [vmem:[#allocation7 + $0x8] sm:$0xff] %v629_v37 }
 0x146   :  { %892 = shalt.err (!%p889_p6)
}
 0x147   :  { %s893_s17 = scalar_lea.hbm %s982_s3, 256 }
 0x148   :  { %p894_p7 = scmp.ne.s32.totalorder %s982_s3, %s893_s17  ;;  %p897_p8 = scmp.lt.u32.totalorder %s893_s17, %s982_s3 }
 0x14a   :  { %p899_p9 = pnand %p897_p8, %p894_p7 }
 0x14c   :  { %902 = shalt.err (!%p899_p9)
}
 0x14d   :  { %s918_s22 = smov 128   ;;  %s919_s23 = smov 8  }
 0x14e   :  { %645 = dma.vmem_to_hbm [thread:$0]  %s640_s13, 256, %s982_s3, [#allocation4], %s918_s22, %s918_s22, %s919_s23  }
 0x14f   :  { %907 = dma.done.wait [#allocation4], 256  }
 0x150   :  { %908 = vsyncadd [#allocation4], 4294967040 }
 0x151   :  { %649 = vsyncpa [#allocation3], 1 }
 0x152   :  { %650 = vsyncpa [#allocation6], 1 }
 0x153   :  { %651 = vsyncpa [#allocation4], 1 }

</bundles_post_ra>
